<compile_context>
chip_gen: v6e
topology: v6e:2x2x1
jax: 0.10.0
libtpu: 0.0.40
codegen_flags: <defaults>
</compile_context>

<pallas_src>
import functools

import jax
import jax.numpy as jnp
from jax.experimental import pallas as pl
from jax.experimental.pallas import tpu as pltpu


def _round_up(x, m):
    return (x + m - 1) // m * m


def _attention_kernel(e1_ref, e2_ref, w_ref, u_ref, out_ref, alpha_ref):
    e1 = e1_ref[...]                                   # (tm, Fp)  input dtype
    e2 = e2_ref[...]                                   # (tm, Fp)  input dtype
    w = w_ref[...].astype(e1.dtype)                    # (Fp, Dp)  (no-op for f32)
    u = u_ref[...].astype(jnp.float32)                 # (1, Dp)

    # v = tanh(emb @ w_omega), per modality, f32 accumulation on the MXU.
    v1 = jnp.tanh(jnp.dot(e1, w, preferred_element_type=jnp.float32))  # (tm, Dp)
    v2 = jnp.tanh(jnp.dot(e2, w, preferred_element_type=jnp.float32))  # (tm, Dp)

    # vu = v @ u_omega  -> one score per (row, modality); VPU mul + lane reduce
    # (a (Dp, 1) MXU matmul would waste the array, keep it on VPU/XLU).
    s1 = jnp.sum(v1 * u, axis=-1, keepdims=True)       # (tm, 1)
    s2 = jnp.sum(v2 * u, axis=-1, keepdims=True)       # (tm, 1)

    # 2-way numerically-stable softmax over the modality axis.
    m = jnp.maximum(s1, s2)
    p1 = jnp.exp(s1 - m)
    p2 = jnp.exp(s2 - m)
    inv = pl.reciprocal(p1 + p2, approx=False)         # tiny (tm, 1) vector
    a1 = p1 * inv
    a2 = p2 * inv

    # emb_combined = alpha1 * emb1 + alpha2 * emb2, done in the input dtype.
    out_ref[...] = (a1.astype(e1.dtype) * e1 +
                    a2.astype(e2.dtype) * e2).astype(out_ref.dtype)

    # Lane-dense alpha tile: column 0 = a1, column 1 = a2, rest zero.
    lane = jax.lax.broadcasted_iota(jnp.int32, alpha_ref.shape, 1)
    alpha_ref[...] = jnp.where(
        lane == 0, a1, jnp.where(lane == 1, a2, 0.0)
    ).astype(alpha_ref.dtype)


@functools.partial(jax.jit, static_argnames=("tm", "vmem_limit_bytes"))
def attention_layer_forward(emb1, emb2, w_omega, u_omega, *, tm=None,
                            vmem_limit_bytes=None):
    """emb1, emb2: (N, in_feat). Returns (out (N, in_feat), alpha (N, 2))."""
    n, in_feat = emb1.shape
    out_feat = w_omega.shape[1]

    # Pad feature dims to lane multiples so every big-tile DMA / store is
    # unmasked; pad rows to a tile multiple so ragged N works.
    f_pad = _round_up(in_feat, 128)
    d_pad = _round_up(out_feat, 128)

    if tm is None:
        # Auto tile: as many rows as possible (cap 1024) while the
        # double-buffered e1/e2/out tiles + weights stay under ~24 MiB, which
        # fits the default scoped VMEM limit on v5e/v6e/v7x.  For v6e/v5e you
        # can raise vmem_limit_bytes (128 MiB physical) and pass a larger tm;
        # on v7x (64 MiB physical) keep roughly half of that.
        in_bytes = emb1.dtype.itemsize
        fixed = 2 * (f_pad * d_pad + d_pad) * 4            # resident weights
        per_row = 2 * (f_pad * 3 * in_bytes + 128 * 4)     # e1+e2+out+alpha, 2 bufs
        budget = 24 * (1 << 20) - fixed
        tm = max(8, min(1024, (budget // per_row) // 8 * 8))
    tm = min(tm, _round_up(n, 8))                          # tiny N: single tile
    n_pad = _round_up(n, tm)

    emb1_p = jnp.pad(emb1, ((0, n_pad - n), (0, f_pad - in_feat)))
    emb2_p = jnp.pad(emb2, ((0, n_pad - n), (0, f_pad - in_feat)))
    w_p = jnp.pad(w_omega, ((0, f_pad - in_feat), (0, d_pad - out_feat)))
    u_row = jnp.pad(u_omega[:, 0], (0, d_pad - out_feat)).reshape(1, d_pad)

    grid = (n_pad // tm,)
    out_shapes = (
        jax.ShapeDtypeStruct((n_pad, f_pad), emb1.dtype),
        jax.ShapeDtypeStruct((n_pad, 128), jnp.float32),
    )

    out_p, alpha_p = pl.pallas_call(
        _attention_kernel,
        out_shape=out_shapes,
        grid_spec=pltpu.PrefetchScalarGridSpec(
            num_scalar_prefetch=0,
            grid=grid,
            in_specs=[
                pl.BlockSpec((tm, f_pad), lambda i: (i, 0)),      # emb1 row tile
                pl.BlockSpec((tm, f_pad), lambda i: (i, 0)),      # emb2 row tile
                pl.BlockSpec((f_pad, d_pad), lambda i: (0, 0)),   # w_omega
                pl.BlockSpec((1, d_pad), lambda i: (0, 0)),       # u_omega (row)
            ],
            out_specs=[
                pl.BlockSpec((tm, f_pad), lambda i: (i, 0)),      # combined emb
                pl.BlockSpec((tm, 128), lambda i: (i, 0)),        # alpha (padded)
            ],
        ),
        compiler_params=pltpu.CompilerParams(
            dimension_semantics=("parallel",),
            vmem_limit_bytes=vmem_limit_bytes,
        ),
    )(emb1_p, emb2_p, w_p, u_row)

    return out_p[:n, :in_feat], alpha_p[:n, :2]


def _xavier_uniform(key, shape, dtype=jnp.float32):
    fan_in, fan_out = shape[0], shape[1]
    bound = (6.0 / (fan_in + fan_out)) ** 0.5
    return jax.random.uniform(key, shape, dtype, minval=-bound, maxval=bound)


def _reference(emb1, emb2, w_omega, u_omega):
    emb = jnp.stack([emb1, emb2], axis=1)                     # (N, 2, F)
    v = jnp.tanh(jnp.einsum("nmf,fd->nmd", emb, w_omega))     # (N, 2, D)
    vu = jnp.einsum("nmd,do->nmo", v, u_omega)[..., 0]        # (N, 2)
    alpha = jax.nn.softmax(vu + 1e-6, axis=-1)                # (N, 2)
    out = jnp.einsum("nmf,nm->nf", emb, alpha)                # (N, F)
    return out, alpha


if __name__ == "__main__":
    key = jax.random.PRNGKey(0)
    k1, k2, kw, ku = jax.random.split(key, 4)

    N, IN_FEAT, OUT_FEAT = 16, 32, 16   # small synthetic shapes

    emb1 = jax.random.normal(k1, (N, IN_FEAT), jnp.float32)
    emb2 = jax.random.normal(k2, (N, IN_FEAT), jnp.float32)
    w_omega = _xavier_uniform(kw, (IN_FEAT, OUT_FEAT))
    u_omega = _xavier_uniform(ku, (OUT_FEAT, 1))

    out, alpha = attention_layer_forward(emb1, emb2, w_omega, u_omega)
    out = jax.block_until_ready(out)
    alpha = jax.block_until_ready(alpha)

    ref_out, ref_alpha = _reference(emb1, emb2, w_omega, u_omega)
    assert out.shape == (N, IN_FEAT) and alpha.shape == (N, 2)
    assert jnp.allclose(out, ref_out, atol=1e-5, rtol=1e-5)
    assert jnp.allclose(alpha, ref_alpha, atol=1e-5, rtol=1e-5)

    print("KERNEL_OK")
</pallas_src>

<mosaic_0001>
module attributes {stable_mosaic.version = 11 : i64} {
  func.func @_attention_kernel(%arg0: i32, %arg1: memref<16x128xf32, #tpu.memory_space<vmem>>, %arg2: memref<16x128xf32, #tpu.memory_space<vmem>>, %arg3: memref<128x128xf32, #tpu.memory_space<vmem>>, %arg4: memref<1x128xf32, #tpu.memory_space<vmem>>, %arg5: memref<16x128xf32, #tpu.memory_space<vmem>>, %arg6: memref<16x128xf32, #tpu.memory_space<vmem>>) attributes {dimension_semantics = [#tpu.dimension_semantics<parallel>], iteration_bounds = array<i64: 1>, scalar_prefetch = 0 : i64, scratch_operands = 0 : i64, tpu.core_type = #tpu.core_type<tc>, window_params = [{transform_indices = @transform_0, window_bounds = array<i64: 16, 128>}, {transform_indices = @transform_1, window_bounds = array<i64: 16, 128>}, {pipeline_mode = #tpu.pipeline_mode<synchronous>, transform_indices = @transform_2, window_bounds = array<i64: 128, 128>}, {pipeline_mode = #tpu.pipeline_mode<synchronous>, transform_indices = @transform_3, window_bounds = array<i64: 1, 128>}, {transform_indices = @transform_4, window_bounds = array<i64: 16, 128>}, {transform_indices = @transform_5, window_bounds = array<i64: 16, 128>}]} {
    %c0 = arith.constant 0 : index
    %c0_0 = arith.constant 0 : index
    %0 = vector.load %arg1[%c0, %c0_0] : memref<16x128xf32, #tpu.memory_space<vmem>>, vector<16x128xf32>
    %c0_1 = arith.constant 0 : index
    %c0_2 = arith.constant 0 : index
    %1 = vector.load %arg2[%c0_1, %c0_2] : memref<16x128xf32, #tpu.memory_space<vmem>>, vector<16x128xf32>
    %c0_3 = arith.constant 0 : index
    %c0_4 = arith.constant 0 : index
    %2 = vector.load %arg3[%c0_3, %c0_4] : memref<128x128xf32, #tpu.memory_space<vmem>>, vector<128x128xf32>
    %c0_5 = arith.constant 0 : index
    %c0_6 = arith.constant 0 : index
    %3 = vector.load %arg4[%c0_5, %c0_6] : memref<1x128xf32, #tpu.memory_space<vmem>>, vector<1x128xf32>
    %cst = arith.constant dense<0.000000e+00> : vector<16x128xf32>
    %4 = tpu.matmul %0, %2, %cst {dimension_numbers = #tpu.dot_dimension_numbers<[1], [0], [0], [1], [0, 0, 1, 1], [], []>} : vector<16x128xf32>, vector<128x128xf32>, vector<16x128xf32> -> vector<16x128xf32>
    %5 = math.tanh %4 : vector<16x128xf32>
    %cst_7 = arith.constant dense<0.000000e+00> : vector<16x128xf32>
    %6 = tpu.matmul %1, %2, %cst_7 {dimension_numbers = #tpu.dot_dimension_numbers<[1], [0], [0], [1], [0, 0, 1, 1], [], []>} : vector<16x128xf32>, vector<128x128xf32>, vector<16x128xf32> -> vector<16x128xf32>
    %7 = math.tanh %6 : vector<16x128xf32>
    %8 = vector.broadcast %3 : vector<1x128xf32> to vector<16x128xf32>
    %9 = arith.mulf %5, %8 : vector<16x128xf32>
    %cst_8 = arith.constant dense<0.000000e+00> : vector<16xf32>
    %10 = vector.multi_reduction <add>, %9, %cst_8 [1] : vector<16x128xf32> to vector<16xf32>
    %11 = vector.shape_cast %10 : vector<16xf32> to vector<16x1xf32>
    %12 = vector.broadcast %3 : vector<1x128xf32> to vector<16x128xf32>
    %13 = arith.mulf %7, %12 : vector<16x128xf32>
    %cst_9 = arith.constant dense<0.000000e+00> : vector<16xf32>
    %14 = vector.multi_reduction <add>, %13, %cst_9 [1] : vector<16x128xf32> to vector<16xf32>
    %15 = vector.shape_cast %14 : vector<16xf32> to vector<16x1xf32>
    %16 = arith.maximumf %11, %15 : vector<16x1xf32>
    %17 = arith.subf %11, %16 : vector<16x1xf32>
    %18 = math.exp %17 : vector<16x1xf32>
    %19 = arith.subf %15, %16 : vector<16x1xf32>
    %20 = math.exp %19 : vector<16x1xf32>
    %21 = arith.addf %18, %20 : vector<16x1xf32>
    %22 = tpu.reciprocal %21 : vector<16x1xf32> -> vector<16x1xf32>
    %23 = arith.mulf %18, %22 : vector<16x1xf32>
    %24 = arith.mulf %20, %22 : vector<16x1xf32>
    %25 = vector.broadcast %23 : vector<16x1xf32> to vector<16x128xf32>
    %26 = arith.mulf %25, %0 : vector<16x128xf32>
    %27 = vector.broadcast %24 : vector<16x1xf32> to vector<16x128xf32>
    %28 = arith.mulf %27, %1 : vector<16x128xf32>
    %29 = arith.addf %26, %28 : vector<16x128xf32>
    %c0_10 = arith.constant 0 : index
    %c0_11 = arith.constant 0 : index
    %30 = vector.load %arg5[%c0_10, %c0_11] : memref<16x128xf32, #tpu.memory_space<vmem>>, vector<16x128xf32>
    tpu.vector_store %arg5[%c0_10, %c0_11], %29 {strides = array<i32>} : memref<16x128xf32, #tpu.memory_space<vmem>>, vector<16x128xf32>,
    %31 = tpu.iota {dimensions = array<i32: 1>} : vector<16x128xi32>
    %c0_i32 = arith.constant 0 : i32
    %32 = vector.broadcast %c0_i32 : i32 to vector<16x128xi32>
    %33 = arith.cmpi eq, %31, %32 : vector<16x128xi32>
    %c1_i32 = arith.constant 1 : i32
    %34 = vector.broadcast %c1_i32 : i32 to vector<16x128xi32>
    %35 = arith.cmpi eq, %31, %34 : vector<16x128xi32>
    %cst_12 = arith.constant 0.000000e+00 : f32
    %36 = vector.shape_cast %24 : vector<16x1xf32> to vector<16x1xf32>
    %37 = vector.broadcast %36 : vector<16x1xf32> to vector<16x128xf32>
    %38 = vector.broadcast %cst_12 : f32 to vector<16x128xf32>
    %39 = arith.select %35, %37, %38 : vector<16x128xi1>, vector<16x128xf32>
    %40 = vector.shape_cast %23 : vector<16x1xf32> to vector<16x1xf32>
    %41 = vector.broadcast %40 : vector<16x1xf32> to vector<16x128xf32>
    %42 = arith.select %33, %41, %39 : vector<16x128xi1>, vector<16x128xf32>
    %c0_13 = arith.constant 0 : index
    %c0_14 = arith.constant 0 : index
    %43 = vector.load %arg6[%c0_13, %c0_14] : memref<16x128xf32, #tpu.memory_space<vmem>>, vector<16x128xf32>
    tpu.vector_store %arg6[%c0_13, %c0_14], %42 {strides = array<i32>} : memref<16x128xf32, #tpu.memory_space<vmem>>, vector<16x128xf32>,
    return
  }
  func.func @transform_0(%arg0: i32) -> (i32, i32) {
    %c0_i32 = arith.constant 0 : i32
    %c0_i32_0 = arith.constant 0 : i32
    return %arg0, %c0_i32 : i32, i32
  }
  func.func @transform_1(%arg0: i32) -> (i32, i32) {
    %c0_i32 = arith.constant 0 : i32
    %c0_i32_0 = arith.constant 0 : i32
    return %arg0, %c0_i32 : i32, i32
  }
  func.func @transform_2(%arg0: i32) -> (i32, i32) {
    %c0_i32 = arith.constant 0 : i32
    %c0_i32_0 = arith.constant 0 : i32
    %c0_i32_1 = arith.constant 0 : i32
    return %c0_i32, %c0_i32_0 : i32, i32
  }
  func.func @transform_3(%arg0: i32) -> (i32, i32) {
    %c0_i32 = arith.constant 0 : i32
    %c0_i32_0 = arith.constant 0 : i32
    %c0_i32_1 = arith.constant 0 : i32
    return %c0_i32, %c0_i32_0 : i32, i32
  }
  func.func @transform_4(%arg0: i32) -> (i32, i32) {
    %c0_i32 = arith.constant 0 : i32
    %c0_i32_0 = arith.constant 0 : i32
    return %arg0, %c0_i32 : i32, i32
  }
  func.func @transform_5(%arg0: i32) -> (i32, i32) {
    %c0_i32 = arith.constant 0 : i32
    %c0_i32_0 = arith.constant 0 : i32
    return %arg0, %c0_i32 : i32, i32
  }
}

</mosaic_0001>

<bundles_post_ra>
// kernel: attention_layer_forward.1
= control target key start
LH: loop header
LB: loop body
LE: loop exit
PB: predicated region body
PF: predicated region fallthrough
CT: control target
= control target key end

     0   :  { %s550_s0 = inlined_call_operand.vmem [shape: f32[16,128], index: 0, kind: input, shape index: {}]   ;;  %s551_s1 = inlined_call_operand.vmem [shape: f32[16,128], index: 1, kind: input, shape index: {}]   ;;  %s552_s2 = inlined_call_operand.vmem [shape: f32[128,128], index: 2, kind: input, shape index: {}]   ;;  %s553_s3 = inlined_call_operand.vmem [shape: f32[1,128], index: 3, kind: input, shape index: {}]   ;;  %s554_s4 = inlined_call_operand.hbm [shape: f32[16,128], index: 4, kind: output, shape index: {0}]   ;;  %s555_s5 = inlined_call_operand.vmem [shape: f32[16,128], index: 5, kind: output, shape index: {1}]  }
   0x1   :  { %v39_v0 = vld [vmem:[%s552_s2 + $0x78] sm:$0xff]  ;;  %v38_v1 = vld [vmem:[%s552_s2 + $0x70] sm:$0xff]  ;;  %v37_v2 = vld [vmem:[%s552_s2 + $0x68] sm:$0xff] }
   0x2   :  { %310 = vmatprep.subr.mxu0 %v39_v0  ;;  %345 = vmatprep.subr.mxu1 %v39_v0  ;;  %v36_v3 = vld [vmem:[%s552_s2 + $0x60] sm:$0xff]  ;;  %v35_v4 = vld [vmem:[%s552_s2 + $0x58] sm:$0xff] }
   0x3   :  { %311 = vmatpush3.msra.mxu0 %v39_v0  ;;  %346 = vmatpush3.msra.mxu1 %v39_v0 }
   0x4   :  { %312 = vmatprep.subr.mxu0 %v38_v1  ;;  %347 = vmatprep.subr.mxu1 %v38_v1 }
   0x5   :  { %313 = vmatpush3.msra.mxu0 %v38_v1  ;;  %348 = vmatpush3.msra.mxu1 %v38_v1 }
   0x6   :  { %314 = vmatprep.subr.mxu0 %v37_v2  ;;  %349 = vmatprep.subr.mxu1 %v37_v2 }
   0x7   :  { %315 = vmatpush3.msra.mxu0 %v37_v2  ;;  %350 = vmatpush3.msra.mxu1 %v37_v2 }
   0x8   :  { %11 = vsyncpa [#allocation3], 0  ;;  %316 = vmatprep.subr.mxu0 %v36_v3  ;;  %351 = vmatprep.subr.mxu1 %v36_v3  ;;  %v34_v5 = vld [vmem:[%s552_s2 + $0x50] sm:$0xff]  ;;  %v33_v6 = vld [vmem:[%s552_s2 + $0x48] sm:$0xff]  ;;  %v243_v53 = vlaneseq  ;;  %s425_s8 = smov [#allocation2]  }
   0x9   :  { %317 = vmatpush3.msra.mxu0 %v36_v3  ;;  %352 = vmatpush3.msra.mxu1 %v36_v3  ;;  %v32_v7 = vld [vmem:[%s552_s2 + $0x40] sm:$0xff]  ;;  %v31_v8 = vld [vmem:[%s552_s2 + $0x38] sm:$0xff]  ;;  %v30_v9 = vld [vmem:[%s552_s2 + $0x30] sm:$0xff]  ;;  %s258_s9 = sshll.u32 %s425_s8, 4  ;;  %s259_s9 = int_to_ptr.vmem [resolvable:$true] %s258_s9 }
   0xa   :  { %318 = vmatprep.subr.mxu0 %v35_v4  ;;  %353 = vmatprep.subr.mxu1 %v35_v4  ;;  %v29_v10 = vld [vmem:[%s552_s2 + $0x28] sm:$0xff]  ;;  %v28_v11 = vld [vmem:[%s552_s2 + $0x20] sm:$0xff]  ;;  %v27_v12 = vld [vmem:[%s552_s2 + $0x18] sm:$0xff]  ;;  %v244_v54 = vand.u32 127, %v243_v53  ;;  %s403_s12 = scalar_lea.vmem %s259_s9, 256  ;;  %p408_p1 = scmp.lt.s32.totalorder %s259_s9, %s259_s9 }
   0xb   :  { %319 = vmatpush3.msra.mxu0 %v35_v4  ;;  %354 = vmatpush3.msra.mxu1 %v35_v4  ;;  %v26_v13 = vld [vmem:[%s552_s2 + $0x10] sm:$0xff]  ;;  %v25_v14 = vld [vmem:[%s552_s2 + $0x8] sm:$0xff]  ;;  %v24_v15 = vld [vmem:[%s552_s2] sm:$0xff]  ;;  %p404_p0 = scmp.ne.s32.totalorder %s259_s9, %s403_s12  ;;  %p409_p2 = scmp.lt.s32.totalorder %s403_s12, %s403_s12 }
   0xc   :  { %320 = vmatprep.subr.mxu0 %v34_v5  ;;  %355 = vmatprep.subr.mxu1 %v34_v5  ;;  %v509_v16 = vld [vmem:[%s550_s0] sm:$0xff]  ;;  %v519_v18 = vld [vmem:[%s550_s0 + $0x8] sm:$0xff]  ;;  %vm246_vm0 = vcmp.eq.s32.totalorder %v244_v54, 1  ;;  %vm245_vm1 = vcmp.eq.s32.totalorder %v244_v54, 0 }
   0xd   :  { %321 = vmatpush3.msra.mxu0 %v34_v5  ;;  %356 = vmatpush3.msra.mxu1 %v34_v5  ;;  %v514_v17 = vld [vmem:[%s551_s1] sm:$0xff]  ;;  %v524_v19 = vld [vmem:[%s551_s1 + $0x8] sm:$0xff]  ;;  %p410_p3 = por %p409_p2, %p408_p1 }
   0xe   :  { %322 = vmatprep.subr.mxu0 %v33_v6  ;;  %357 = vmatprep.subr.mxu1 %v33_v6  ;;  %v273_v25 = vld [vmem:[%s553_s3] ss:$0 sm:$0xff] }
   0xf   :  { %323 = vmatpush3.msra.mxu0 %v33_v6  ;;  %358 = vmatpush3.msra.mxu1 %v33_v6  ;;  %p411_p4 = pnand %p410_p3, %p404_p0 }
  0x10   :  { %324 = vmatprep.subr.mxu0 %v32_v7  ;;  %359 = vmatprep.subr.mxu1 %v32_v7 }
  0x11   :  { %325 = vmatpush3.msra.mxu0 %v32_v7  ;;  %360 = vmatpush3.msra.mxu1 %v32_v7 }
  0x12   :  { %326 = vmatprep.subr.mxu0 %v31_v8  ;;  %361 = vmatprep.subr.mxu1 %v31_v8 }
  0x13   :  { %327 = vmatpush3.msra.mxu0 %v31_v8  ;;  %362 = vmatpush3.msra.mxu1 %v31_v8 }
  0x14   :  { %328 = vmatprep.subr.mxu0 %v30_v9  ;;  %363 = vmatprep.subr.mxu1 %v30_v9 }
  0x15   :  { %329 = vmatpush3.msra.mxu0 %v30_v9  ;;  %364 = vmatpush3.msra.mxu1 %v30_v9 }
  0x16   :  { %330 = vmatprep.subr.mxu0 %v29_v10  ;;  %365 = vmatprep.subr.mxu1 %v29_v10 }
  0x17   :  { %331 = vmatpush3.msra.mxu0 %v29_v10  ;;  %366 = vmatpush3.msra.mxu1 %v29_v10 }
  0x18   :  { %332 = vmatprep.subr.mxu0 %v28_v11  ;;  %367 = vmatprep.subr.mxu1 %v28_v11 }
  0x19   :  { %333 = vmatpush3.msra.mxu0 %v28_v11  ;;  %368 = vmatpush3.msra.mxu1 %v28_v11 }
  0x1a   :  { %334 = vmatprep.subr.mxu0 %v27_v12  ;;  %369 = vmatprep.subr.mxu1 %v27_v12 }
  0x1b   :  { %335 = vmatpush3.msra.mxu0 %v27_v12  ;;  %370 = vmatpush3.msra.mxu1 %v27_v12 }
  0x1c   :  { %336 = vmatprep.subr.mxu0 %v26_v13  ;;  %371 = vmatprep.subr.mxu1 %v26_v13 }
  0x1d   :  { %337 = vmatpush3.msra.mxu0 %v26_v13  ;;  %372 = vmatpush3.msra.mxu1 %v26_v13 }
  0x1e   :  { %338 = vmatprep.subr.mxu0 %v25_v14  ;;  %373 = vmatprep.subr.mxu1 %v25_v14 }
  0x1f   :  { %339 = vmatpush3.msra.mxu0 %v25_v14  ;;  %374 = vmatpush3.msra.mxu1 %v25_v14 }
  0x20   :  { %340 = vmatprep.subr.mxu0 %v24_v15  ;;  %375 = vmatprep.subr.mxu1 %v24_v15 }
  0x21   :  { %341 = vmatpush3.msra.mxu0 %v24_v15  ;;  %342 = vmatprep.mubr.f32.mxu0 %v509_v16 }
  0x22   :  { %376 = vmatpush3.msra.mxu1 %v24_v15  ;;  %377 = vmatprep.mubr.f32.mxu1 %v514_v17 }
  0x23   :  { %343 = vmatmul.mubr.f32.vlgmr.msra.gmra.mxu0 %v519_v18  ;;  %378 = vmatmul.mubr.f32.vlgmr.msra.gmra.mxu1 %v524_v19 }
  0xe3   :  { %v344_v20 = vpop.f32.mrf.mxu0  ;;  %v379_v21 = vpop.f32.mrf.mxu1 }
  0xe5   :  { %v107_v22 = vpop.f32.mrf.mxu0  ;;  %v184_v23 = vpop.f32.mrf.mxu1 }
  0xe6   :  { %383 = vtanh.f32 %v107_v22 }
  0xe7   :  { %385 = vtanh.f32 %v184_v23 }
  0xe8   :  { %387 = vtanh.f32 %v344_v20 }
  0xe9   :  { %389 = vtanh.f32 %v379_v21 }
  0xf3   :  { %v384_v24 = vpop.eup %383 }
  0xf4   :  { %v386_v26 = vpop.eup %385  ;;  %v201_v27 = vmul.f32 %v384_v24, %v273_v25 }
  0xf5   :  { %v388_v28 = vpop.eup %387  ;;  %v207_v29 = vmul.f32 %v386_v26, %v273_v25 }
  0xf6   :  { %v390_v30 = vpop.eup %389  ;;  %203 = vadd.xlane.f32.xlu0 %v201_v27  ;;  %v202_v31 = vmul.f32 %v388_v28, %v273_v25 }
  0xf7   :  { %209 = vadd.xlane.f32.xlu1 %v207_v29  ;;  %v208_v32 = vmul.f32 %v390_v30, %v273_v25 }
  0xfa   :  { %205 = vadd.xlane.f32.xlu0 %v202_v31 }
  0xfb   :  { %211 = vadd.xlane.f32.xlu1 %v208_v32 }
 0x17f   :  { %v204_v33 = vpop.xlane.xlu0 %203 }
 0x180   :  { %v210_v34 = vpop.xlane.xlu1 %209 }
 0x181   :  { %v213_v35 = vmax.f32 %v204_v33, %v210_v34 }
 0x183   :  { %v215_v36 = vsub.f32 %v204_v33, %v213_v35  ;;  %v221_v37 = vsub.f32 %v210_v34, %v213_v35  ;;  %v206_v38 = vpop.xlane.xlu0 %205 }
 0x184   :  { %v212_v39 = vpop.xlane.xlu1 %211 }
 0x185   :  { %v217_v40 = vmul.f32 1.442695, %v215_v36  ;;  %v223_v41 = vmul.f32 1.442695, %v221_v37  ;;  %v214_v42 = vmax.f32 %v206_v38, %v212_v39 }
 0x187   :  { %391 = vpow2.f32 %v217_v40  ;;  %v216_v43 = vsub.f32 %v206_v38, %v214_v42  ;;  %v222_v44 = vsub.f32 %v212_v39, %v214_v42 }
 0x188   :  { %393 = vpow2.f32 %v223_v41 }
 0x189   :  { %v219_v45 = vmul.f32 1.442695, %v216_v43  ;;  %v225_v46 = vmul.f32 1.442695, %v222_v44 }
 0x18b   :  { %395 = vpow2.f32 %v219_v45 }
 0x18c   :  { %397 = vpow2.f32 %v225_v46 }
 0x194   :  { %v392_v47 = vpop.eup %391 }
 0x195   :  { %v394_v48 = vpop.eup %393 }
 0x196   :  { %v227_v49 = vadd.f32 %v394_v48, %v392_v47 }
 0x198   :  { %v396_v50 = vpop.eup %395  ;;  %399 = vrcp.f32 %v227_v49 }
 0x199   :  { %v398_v51 = vpop.eup %397 }
 0x19a   :  { %v228_v52 = vadd.f32 %v398_v51, %v396_v50 }
 0x19c   :  { %401 = vrcp.f32 %v228_v52 }
 0x1a5   :  { %v400_v55 = vpop.eup %399 }
 0x1a6   :  { %v231_v56 = vmul.f32 %v400_v55, %v392_v47  ;;  %v233_v57 = vmul.f32 %v400_v55, %v394_v48 }
 0x1a8   :  { %v235_v58 = vmul.f32 %v231_v56, %v509_v16  ;;  %v237_v59 = vmul.f32 %v233_v57, %v514_v17  ;;  %v247_v60 = vsel %vm246_vm0, %v233_v57, 0.0 }
 0x1a9   :  { %v402_v61 = vpop.eup %401  ;;  %v249_v62 = vsel %vm245_vm1, %v231_v56, %v247_v60 }
 0x1aa   :  { %v232_v63 = vmul.f32 %v402_v61, %v396_v50  ;;  %v234_v0 = vmul.f32 %v402_v61, %v398_v51  ;;  %v239_v1 = vadd.f32 %v237_v59, %v235_v58  ;;  %251 = vst [vmem:[%s555_s5] sm:$0xff] %v249_v62 }
 0x1ac   :  { %v236_v2 = vmul.f32 %v232_v63, %v519_v18  ;;  %v238_v3 = vmul.f32 %v234_v0, %v524_v19  ;;  %241 = vst [vmem:[#allocation2] sm:$0xff] %v239_v1  ;;  %v248_v4 = vsel %vm246_vm0, %v234_v0, 0.0 }
 0x1ad   :  { %v250_v5 = vsel %vm245_vm1, %v232_v63, %v248_v4 }
 0x1ae   :  { %v240_v6 = vadd.f32 %v238_v3, %v236_v2  ;;  %252 = vst [vmem:[%s555_s5 + $0x8] sm:$0xff] %v250_v5 }
 0x1b0   :  { %242 = vst [vmem:[#allocation2 + $0x8] sm:$0xff] %v240_v6 }
 0x1b1   :  { %414 = shalt.err (!%p411_p4)
}
 0x1b2   :  { %s426_s13 = smov 128   ;;  %s427_s14 = smov 8  }
 0x1b3   :  { %264 = dma.vmem_to_hbm [thread:$0]  %s259_s9, 256, %s554_s4, [#allocation3], %s426_s13, %s426_s13, %s427_s14  }
 0x1b4   :  { %423 = dma.done.wait [#allocation3], 256  }
 0x1b5   :  { %424 = vsyncadd [#allocation3], 4294967040 }
 0x1b6   :  { %272 = vsyncpa [#allocation3], 1 }

</bundles_post_ra>
